<compile_context>
chip_gen: v5e
topology: v5e:2x2
jax: 0.10.0
libtpu: 0.0.40
codegen_flags: <defaults>
</compile_context>

<pallas_src>
import functools

import jax
import jax.numpy as jnp
from jax.experimental import pallas as pl
from jax.experimental.pallas import tpu as pltpu

_MIB = 1 << 20


def _round_up(x, m):
    return ((x + m - 1) // m) * m


def _sublane_multiple(dtype):
    # Sub-32-bit dtypes pack along sublanes: bf16 tile is (16,128), int8 (32,128).
    return {4: 8, 2: 16, 1: 32}.get(jnp.dtype(dtype).itemsize, 8)


def _vmem_capacity_bytes():
    try:
        info = pltpu.get_tpu_info()
        cap = getattr(info, "vmem_capacity_bytes", None)
        if cap:
            return int(cap)
    except Exception:
        pass
    return 64 * _MIB  # conservative default (v7x per-TensorCore)


# ----------------------------------------------------------------------------
# Kernels
# ----------------------------------------------------------------------------
def _linear_kernel_1k(x_ref, w_ref, b_ref, o_ref):
    # Fast path: single reduction step (whole padded D resident). No scratch,
    # no branches: dot + bias + cast, lane-dense store.
    o_ref[...] = (
        jnp.dot(x_ref[...], w_ref[...], preferred_element_type=jnp.float32)
        + b_ref[...].astype(jnp.float32)
    ).astype(o_ref.dtype)


def _linear_kernel_acc(x_ref, w_ref, b_ref, o_ref, acc_ref, *, tile_k, x_resident):
    # General path: grid = (n_c, n_k), K (reduction) axis last / "arbitrary".
    k = pl.program_id(1)

    @pl.when(k == 0)
    def _init():
        acc_ref[...] = jnp.zeros_like(acc_ref)

    if x_resident:
        start = pl.multiple_of(k * tile_k, 128)
        x_blk = x_ref[:, pl.ds(start, tile_k)]
    else:
        x_blk = x_ref[...]

    acc_ref[...] += jnp.dot(x_blk, w_ref[...], preferred_element_type=jnp.float32)

    @pl.when(k == pl.num_programs(1) - 1)
    def _finalize():
        o_ref[...] = (acc_ref[...] + b_ref[...].astype(jnp.float32)).astype(o_ref.dtype)


# ----------------------------------------------------------------------------
# One-time weight preparation (hoisted out of the per-call hot path)
# ----------------------------------------------------------------------------
def prepare_classifier_head(weight, bias, *, compute_dtype=None, tile_c=None):
    """Prepare nn.Linear parameters once (at "model init").

    weight: [num_classes, input_dim] (PyTorch layout), bias: [num_classes].
    Transposes to [D, C], zero-pads to MXU/lane-friendly shapes and optionally
    casts to compute_dtype (e.g. bf16) for weight streaming. Returns a params
    dict consumed by classifier_head_apply().
    """
    C, D = weight.shape
    assert bias.shape == (C,)

    if tile_c is None:
        c128 = _round_up(C, 128)
        if c128 <= 384:
            tile_c = 128          # >=2 class tiles whenever C_pad >= 256 (v7x)
        elif c128 < 2048:
            tile_c = 256
        elif c128 < 8192:
            tile_c = 512
        else:
            tile_c = 1024

    D_pad = _round_up(D, 128)
    C_pad = _round_up(C, tile_c)

    w_dtype = compute_dtype if compute_dtype is not None else weight.dtype
    wp = jnp.zeros((D_pad, C_pad), w_dtype).at[:D, :C].set(weight.T.astype(w_dtype))
    bp = jnp.zeros((1, C_pad), jnp.float32).at[0, :C].set(bias.astype(jnp.float32))

    return dict(wp=wp, bp=bp, D=D, C=C, D_pad=D_pad, C_pad=C_pad,
                tile_c=tile_c, compute_dtype=compute_dtype)


# ----------------------------------------------------------------------------
# Per-call forward
# ----------------------------------------------------------------------------
def classifier_head_apply(x, params, *, vmem_budget_bytes=None):
    """y = x @ W.T + b using prepared params. x: [B, D] -> [B, C] (x.dtype)."""
    B, D = x.shape
    assert D == params["D"]
    C, D_pad, C_pad = params["C"], params["D_pad"], params["C_pad"]
    tile_c = params["tile_c"]
    wp, bp = params["wp"], params["bp"]
    compute_dtype = params["compute_dtype"]
    out_dtype = x.dtype

    x_dtype = compute_dtype if compute_dtype is not None else x.dtype
    B_pad = _round_up(B, _sublane_multiple(x_dtype))
    xp = jnp.zeros((B_pad, D_pad), x_dtype).at[:B, :D].set(x.astype(x_dtype))

    x_item = jnp.dtype(x_dtype).itemsize
    w_item = jnp.dtype(wp.dtype).itemsize
    o_item = jnp.dtype(out_dtype).itemsize

    cap = _vmem_capacity_bytes()
    if vmem_budget_bytes is None:
        # <=48 MiB resident on v7x (64 MiB VMEM), up to 96 MiB on v5e/v6e.
        budget = max(16 * _MIB, min(cap - 16 * _MIB, 96 * _MIB))
    else:
        budget = int(vmem_budget_bytes)
    vmem_limit = int(min(cap, budget + 8 * _MIB))

    n_c = C_pad // tile_c

    def resident_bytes(tile_k, x_resident, single_k):
        xb = B_pad * D_pad * x_item if x_resident else 2 * B_pad * tile_k * x_item
        wb = 2 * tile_k * tile_c * w_item          # double-buffered weight stream
        bb = 2 * tile_c * 4
        ob = 2 * B_pad * tile_c * o_item
        ab = 0 if single_k else B_pad * tile_c * 4
        return xb + wb + bb + ob + ab

    # ---- Fast path: one reduction step (whole padded D resident) -----------
    if resident_bytes(D_pad, True, True) <= budget:
        cost = pl.CostEstimate(
            flops=2 * B * D * C,
            transcendentals=0,
            bytes_accessed=(B_pad * D_pad * x_item + D_pad * C_pad * w_item
                            + C_pad * 4 + B_pad * C_pad * o_item),
        )
        out = pl.pallas_call(
            _linear_kernel_1k,
            out_shape=jax.ShapeDtypeStruct((B_pad, C_pad), out_dtype),
            grid=(n_c,),
            in_specs=[
                pl.BlockSpec((B_pad, D_pad), lambda j: (0, 0)),     # x (resident)
                pl.BlockSpec((D_pad, tile_c), lambda j: (0, j)),    # W stream
                pl.BlockSpec((1, tile_c), lambda j: (0, j)),        # bias
            ],
            out_specs=pl.BlockSpec((B_pad, tile_c), lambda j: (0, j)),
            compiler_params=pltpu.CompilerParams(
                dimension_semantics=("parallel",),
                vmem_limit_bytes=vmem_limit,
            ),
            cost_estimate=cost,
        )(xp, wp, bp)
        return out[:B, :C]

    # ---- General path: tiled reduction with f32 accumulator scratch --------
    x_resident = (B_pad * D_pad * x_item) <= budget // 4
    tile_k = 128
    for cand in (4096, 2048, 1024, 512, 256, 128):
        if D_pad % cand == 0 and resident_bytes(cand, x_resident, False) <= budget:
            tile_k = cand
            break
    n_k = D_pad // tile_k

    kernel = functools.partial(_linear_kernel_acc, tile_k=tile_k,
                               x_resident=x_resident)
    if x_resident:
        x_spec = pl.BlockSpec((B_pad, D_pad), lambda j, k: (0, 0))
        x_bytes = B_pad * D_pad * x_item
    else:
        x_spec = pl.BlockSpec((B_pad, tile_k), lambda j, k: (0, k))
        x_bytes = n_c * B_pad * D_pad * x_item   # re-streamed once per class tile

    cost = pl.CostEstimate(
        flops=2 * B * D * C,
        transcendentals=0,
        bytes_accessed=(x_bytes + D_pad * C_pad * w_item + C_pad * 4
                        + B_pad * C_pad * o_item),
    )

    out = pl.pallas_call(
        kernel,
        out_shape=jax.ShapeDtypeStruct((B_pad, C_pad), out_dtype),
        grid=(n_c, n_k),
        in_specs=[
            x_spec,
            pl.BlockSpec((tile_k, tile_c), lambda j, k: (k, j)),    # W stream
            pl.BlockSpec((1, tile_c), lambda j, k: (0, j)),         # bias
        ],
        out_specs=pl.BlockSpec((B_pad, tile_c), lambda j, k: (0, j)),
        scratch_shapes=[pltpu.VMEM((B_pad, tile_c), jnp.float32)],
        compiler_params=pltpu.CompilerParams(
            dimension_semantics=("parallel", "arbitrary"),
            vmem_limit_bytes=vmem_limit,
        ),
        cost_estimate=cost,
    )(xp, wp, bp)
    return out[:B, :C]


# Convenience one-shot wrapper (weight prep NOT hoisted — prefer prepare+apply).
def classifier_head(x, weight, bias, *, compute_dtype=None):
    params = prepare_classifier_head(weight, bias, compute_dtype=compute_dtype)
    return classifier_head_apply(x, params)


if __name__ == "__main__":
    # Shapes consistent with the module defaults: nn.Linear(768, 100), batch=8.
    input_dim, num_classes, batch = 768, 100, 8

    key = jax.random.PRNGKey(0)
    kx, kw, kb = jax.random.split(key, 3)

    x = jax.random.normal(kx, (batch, input_dim), dtype=jnp.float32)
    # PyTorch nn.Linear layout: weight [num_classes, input_dim], bias [num_classes].
    weight = jax.random.normal(kw, (num_classes, input_dim), dtype=jnp.float32) * 0.02
    bias = jax.random.normal(kb, (num_classes,), dtype=jnp.float32) * 0.02

    ref = x @ weight.T + bias[None, :]

    # --- f32 path (exact nn.Linear semantics), weight prep hoisted ----------
    params = prepare_classifier_head(weight, bias)           # once, at "init"
    out = classifier_head_apply(x, params)                   # hot path
    jax.block_until_ready(out)
    assert out.shape == (batch, num_classes)
    assert jnp.allclose(out, ref, atol=1e-4, rtol=1e-4)

    # --- force the multi-K accumulator path (tiny VMEM budget) --------------
    out_acc = classifier_head_apply(x, params, vmem_budget_bytes=512 * 1024)
    jax.block_until_ready(out_acc)
    assert jnp.allclose(out_acc, ref, atol=1e-4, rtol=1e-4)

    # --- bf16 weight-streaming path (not bit-accurate; f32 accumulation) ----
    params_bf16 = prepare_classifier_head(weight, bias, compute_dtype=jnp.bfloat16)
    out_bf16 = classifier_head_apply(x, params_bf16)
    jax.block_until_ready(out_bf16)
    assert out_bf16.shape == (batch, num_classes)
    assert jnp.allclose(out_bf16, ref, atol=5e-2, rtol=5e-2)

    # --- a wider head to exercise >=2 class tiles / parallel axis -----------
    C2, D2, B2 = 512, 1024, 32
    k2w, k2b, k2x = jax.random.split(jax.random.PRNGKey(1), 3)
    w2 = jax.random.normal(k2w, (C2, D2), dtype=jnp.float32) * 0.02
    b2 = jax.random.normal(k2b, (C2,), dtype=jnp.float32) * 0.02
    x2 = jax.random.normal(k2x, (B2, D2), dtype=jnp.float32)
    p2 = prepare_classifier_head(w2, b2)
    o2 = classifier_head_apply(x2, p2)
    jax.block_until_ready(o2)
    assert jnp.allclose(o2, x2 @ w2.T + b2[None, :], atol=1e-3, rtol=1e-3)

    # TODO(synk): int8 (v5e/v6e) / fp8 (v7x) weight-streaming path with per-tile
    # scales is a further 2-4x in the bandwidth-bound regime; not implemented here.
    print("KERNEL_OK")
</pallas_src>

<mosaic_0001>
module attributes {stable_mosaic.version = 11 : i64} {
  func.func @_linear_kernel_1k(%arg0: i32, %arg1: memref<8x768xf32, #tpu.memory_space<vmem>>, %arg2: memref<768x128xf32, #tpu.memory_space<vmem>>, %arg3: memref<1x128xf32, #tpu.memory_space<vmem>>, %arg4: memref<8x128xf32, #tpu.memory_space<vmem>>) attributes {dimension_semantics = [#tpu.dimension_semantics<parallel>], iteration_bounds = array<i64: 1>, scalar_prefetch = 0 : i64, scratch_operands = 0 : i64, tpu.core_type = #tpu.core_type<tc>, window_params = [{pipeline_mode = #tpu.pipeline_mode<synchronous>, transform_indices = @transform_0, window_bounds = array<i64: 8, 768>}, {transform_indices = @transform_1, window_bounds = array<i64: 768, 128>}, {transform_indices = @transform_2, window_bounds = array<i64: 1, 128>}, {transform_indices = @transform_3, window_bounds = array<i64: 8, 128>}]} {
    %c0 = arith.constant 0 : index
    %c0_0 = arith.constant 0 : index
    %0 = vector.load %arg1[%c0, %c0_0] : memref<8x768xf32, #tpu.memory_space<vmem>>, vector<8x768xf32>
    %c0_1 = arith.constant 0 : index
    %c0_2 = arith.constant 0 : index
    %1 = vector.load %arg2[%c0_1, %c0_2] : memref<768x128xf32, #tpu.memory_space<vmem>>, vector<768x128xf32>
    %cst = arith.constant dense<0.000000e+00> : vector<8x128xf32>
    %2 = tpu.matmul %0, %1, %cst {dimension_numbers = #tpu.dot_dimension_numbers<[1], [0], [0], [1], [0, 0, 1, 1], [], []>} : vector<8x768xf32>, vector<768x128xf32>, vector<8x128xf32> -> vector<8x128xf32>
    %c0_3 = arith.constant 0 : index
    %c0_4 = arith.constant 0 : index
    %3 = vector.load %arg3[%c0_3, %c0_4] : memref<1x128xf32, #tpu.memory_space<vmem>>, vector<1x128xf32>
    %4 = vector.broadcast %3 : vector<1x128xf32> to vector<8x128xf32>
    %5 = arith.addf %2, %4 : vector<8x128xf32>
    %c0_5 = arith.constant 0 : index
    %c0_6 = arith.constant 0 : index
    %6 = vector.load %arg4[%c0_5, %c0_6] : memref<8x128xf32, #tpu.memory_space<vmem>>, vector<8x128xf32>
    tpu.vector_store %arg4[%c0_5, %c0_6], %5 {strides = array<i32>} : memref<8x128xf32, #tpu.memory_space<vmem>>, vector<8x128xf32>,
    return
  }
  func.func @transform_0(%arg0: i32) -> (i32, i32) {
    %c0_i32 = arith.constant 0 : i32
    %c0_i32_0 = arith.constant 0 : i32
    %c0_i32_1 = arith.constant 0 : i32
    return %c0_i32, %c0_i32_0 : i32, i32
  }
  func.func @transform_1(%arg0: i32) -> (i32, i32) {
    %c0_i32 = arith.constant 0 : i32
    %c0_i32_0 = arith.constant 0 : i32
    return %c0_i32, %arg0 : i32, i32
  }
  func.func @transform_2(%arg0: i32) -> (i32, i32) {
    %c0_i32 = arith.constant 0 : i32
    %c0_i32_0 = arith.constant 0 : i32
    return %c0_i32, %arg0 : i32, i32
  }
  func.func @transform_3(%arg0: i32) -> (i32, i32) {
    %c0_i32 = arith.constant 0 : i32
    %c0_i32_0 = arith.constant 0 : i32
    return %c0_i32, %arg0 : i32, i32
  }
}

</mosaic_0001>

<bundles_post_ra>
// kernel: tpu_custom_call.1
= control target key start
LH: loop header
LB: loop body
LE: loop exit
PB: predicated region body
PF: predicated region fallthrough
CT: control target
= control target key end

     0   :  { %8 = vsyncpa [#allocation3], 0  ;;  %s411_s0 = inlined_call_operand.hbm [shape: f32[8,768], index: 0, kind: input, shape index: {}]   ;;  %s412_s1 = inlined_call_operand.hbm [shape: f32[768,128], index: 1, kind: input, shape index: {}]   ;;  %s413_s2 = inlined_call_operand.vmem [shape: f32[1,128], index: 2, kind: input, shape index: {}]   ;;  %s414_s3 = inlined_call_operand.hbm [shape: f32[8,128], index: 3, kind: output, shape index: {}]  }
   0x1   :  { %9 = vsyncpa [#allocation6], 0 }
   0x2   :  { %10 = vsyncpa [#allocation4], 0  ;;  %s16_s14 = sshll.u32 %s411_s0, 4  ;;  %s374_s15 = smov [#allocation2]   ;;  %s17_s14 = int_to_ptr.hbm [resolvable:$true] %s16_s14 }
   0x3   :  { %s18_s16 = sshll.u32 %s374_s15, 4  ;;  %s26_s19 = sshll.u32 %s412_s1, 4  ;;  %s19_s16 = int_to_ptr.vmem [resolvable:$true] %s18_s16  ;;  %s27_s19 = int_to_ptr.hbm [resolvable:$true] %s26_s19 }
   0x4   :  { %21 = dma.hbm_to_vmem [thread:$0]  %s17_s14, 768, %s19_s16, [#allocation3]  }
   0x5   :  { %s375_s20 = smov [#allocation5]   ;;  %s376_s22 = smov 128  }
   0x6   :  { %s28_s21 = sshll.u32 %s375_s20, 4  ;;  %s377_s23 = smov 8   ;;  %s29_s21 = int_to_ptr.vmem [resolvable:$true] %s28_s21 }
   0x7   :  { %34 = dma.hbm_to_vmem [thread:$0]  %s27_s19, 12288, %s29_s21, [#allocation6], %s376_s22, %s376_s22, %s377_s23  }
   0x8   :  { %368 = dma.done.wait [#allocation3], 768  }
   0x9   :  { %369 = vsyncadd [#allocation3], 4294966528 }
   0xa   :  { %370 = dma.done.wait [#allocation6], 12288  }
   0xb   :  { %371 = vsyncadd [#allocation6], 4294955008  ;;  %v66_v0 = vld [vmem:[#allocation5 + $0x78] sm:$0xff]  ;;  %v65_v1 = vld [vmem:[#allocation5 + $0x70] sm:$0xff]  ;;  %s378_s24 = smov [#allocation7]   ;;  %s279_s28 = sshll.u32 %s414_s3, 4  ;;  %s280_s28 = int_to_ptr.hbm [resolvable:$true] %s279_s28 }
   0xc   :  { %v82_v2 = vld [vmem:[#allocation5 + $0xf8] sm:$0xff]  ;;  %151 = vmatpush.msra.mxu0 %v66_v0  ;;  %v81_v3 = vld [vmem:[#allocation5 + $0xf0] sm:$0xff]  ;;  %v64_v4 = vld [vmem:[#allocation5 + $0x68] sm:$0xff]  ;;  %s277_s25 = sshll.u32 %s378_s24, 4  ;;  %s278_s25 = int_to_ptr.vmem [resolvable:$true] %s277_s25 }
   0xd   :  { %171 = vmatpush.msra.mxu1 %v82_v2  ;;  %v80_v5 = vld [vmem:[#allocation5 + $0xe8] sm:$0xff]  ;;  %v63_v6 = vld [vmem:[#allocation5 + $0x60] sm:$0xff]  ;;  %v62_v8 = vld [vmem:[#allocation5 + $0x58] sm:$0xff] }
   0xe   :  { %152 = vmatpush.msra.mxu0 %v65_v1  ;;  %v79_v7 = vld [vmem:[#allocation5 + $0xe0] sm:$0xff]  ;;  %v78_v9 = vld [vmem:[#allocation5 + $0xd8] sm:$0xff]  ;;  %v61_v10 = vld [vmem:[#allocation5 + $0x50] sm:$0xff] }
   0xf   :  { %172 = vmatpush.msra.mxu1 %v81_v3  ;;  %v98_v11 = vld [vmem:[#allocation5 + $0x178] sm:$0xff]  ;;  %v77_v12 = vld [vmem:[#allocation5 + $0xd0] sm:$0xff]  ;;  %v96_v15 = vld [vmem:[#allocation5 + $0x168] sm:$0xff] }
  0x10   :  { %153 = vmatpush.msra.mxu0 %v64_v4  ;;  %191 = vmatpush.msra.mxu2 %v98_v11  ;;  %v97_v13 = vld [vmem:[#allocation5 + $0x170] sm:$0xff]  ;;  %v114_v14 = vld [vmem:[#allocation5 + $0x1f8] sm:$0xff]  ;;  %v60_v17 = vld [vmem:[#allocation5 + $0x48] sm:$0xff] }
  0x11   :  { %173 = vmatpush.msra.mxu1 %v80_v5  ;;  %v113_v16 = vld [vmem:[#allocation5 + $0x1f0] sm:$0xff]  ;;  %v76_v18 = vld [vmem:[#allocation5 + $0xc8] sm:$0xff]  ;;  %211 = vmatpush.msra.mxu3 %v114_v14  ;;  %v95_v19 = vld [vmem:[#allocation5 + $0x160] sm:$0xff] }
  0x12   :  { %154 = vmatpush.msra.mxu0 %v63_v6  ;;  %192 = vmatpush.msra.mxu2 %v97_v13  ;;  %v112_v20 = vld [vmem:[#allocation5 + $0x1e8] sm:$0xff]  ;;  %v59_v21 = vld [vmem:[#allocation5 + $0x40] sm:$0xff]  ;;  %v94_v23 = vld [vmem:[#allocation5 + $0x158] sm:$0xff] }
  0x13   :  { %174 = vmatpush.msra.mxu1 %v79_v7  ;;  %v75_v22 = vld [vmem:[#allocation5 + $0xc0] sm:$0xff]  ;;  %212 = vmatpush.msra.mxu3 %v113_v16  ;;  %v58_v25 = vld [vmem:[#allocation5 + $0x38] sm:$0xff]  ;;  %v93_v27 = vld [vmem:[#allocation5 + $0x150] sm:$0xff] }
  0x14   :  { %155 = vmatpush.msra.mxu0 %v62_v8  ;;  %193 = vmatpush.msra.mxu2 %v96_v15  ;;  %v111_v24 = vld [vmem:[#allocation5 + $0x1e0] sm:$0xff]  ;;  %v74_v26 = vld [vmem:[#allocation5 + $0xb8] sm:$0xff]  ;;  %v57_v29 = vld [vmem:[#allocation5 + $0x30] sm:$0xff] }
  0x15   :  { %175 = vmatpush.msra.mxu1 %v78_v9  ;;  %213 = vmatpush.msra.mxu3 %v112_v20  ;;  %v110_v28 = vld [vmem:[#allocation5 + $0x1d8] sm:$0xff]  ;;  %v73_v30 = vld [vmem:[#allocation5 + $0xb0] sm:$0xff]  ;;  %v92_v31 = vld [vmem:[#allocation5 + $0x148] sm:$0xff] }
  0x16   :  { %156 = vmatpush.msra.mxu0 %v61_v10  ;;  %194 = vmatpush.msra.mxu2 %v95_v19  ;;  %v109_v32 = vld [vmem:[#allocation5 + $0x1d0] sm:$0xff]  ;;  %v56_v33 = vld [vmem:[#allocation5 + $0x28] sm:$0xff]  ;;  %v91_v35 = vld [vmem:[#allocation5 + $0x140] sm:$0xff] }
  0x17   :  { %176 = vmatpush.msra.mxu1 %v77_v12  ;;  %214 = vmatpush.msra.mxu3 %v111_v24  ;;  %v72_v34 = vld [vmem:[#allocation5 + $0xa8] sm:$0xff]  ;;  %v55_v37 = vld [vmem:[#allocation5 + $0x20] sm:$0xff]  ;;  %v90_v39 = vld [vmem:[#allocation5 + $0x138] sm:$0xff] }
  0x18   :  { %157 = vmatpush.msra.mxu0 %v60_v17  ;;  %195 = vmatpush.msra.mxu2 %v94_v23  ;;  %v108_v36 = vld [vmem:[#allocation5 + $0x1c8] sm:$0xff]  ;;  %v71_v38 = vld [vmem:[#allocation5 + $0xa0] sm:$0xff]  ;;  %v54_v41 = vld [vmem:[#allocation5 + $0x18] sm:$0xff] }
  0x19   :  { %177 = vmatpush.msra.mxu1 %v76_v18  ;;  %215 = vmatpush.msra.mxu3 %v110_v28  ;;  %v107_v40 = vld [vmem:[#allocation5 + $0x1c0] sm:$0xff]  ;;  %v70_v42 = vld [vmem:[#allocation5 + $0x98] sm:$0xff]  ;;  %v89_v43 = vld [vmem:[#allocation5 + $0x130] sm:$0xff] }
  0x1a   :  { %158 = vmatpush.msra.mxu0 %v59_v21  ;;  %196 = vmatpush.msra.mxu2 %v93_v27  ;;  %v106_v44 = vld [vmem:[#allocation5 + $0x1b8] sm:$0xff]  ;;  %v53_v45 = vld [vmem:[#allocation5 + $0x10] sm:$0xff]  ;;  %v88_v47 = vld [vmem:[#allocation5 + $0x128] sm:$0xff] }
  0x1b   :  { %178 = vmatpush.msra.mxu1 %v75_v22  ;;  %216 = vmatpush.msra.mxu3 %v109_v32  ;;  %v69_v46 = vld [vmem:[#allocation5 + $0x90] sm:$0xff]  ;;  %v52_v49 = vld [vmem:[#allocation5 + $0x8] sm:$0xff]  ;;  %v87_v51 = vld [vmem:[#allocation5 + $0x120] sm:$0xff] }
  0x1c   :  { %159 = vmatpush.msra.mxu0 %v58_v25  ;;  %197 = vmatpush.msra.mxu2 %v92_v31  ;;  %v105_v48 = vld [vmem:[#allocation5 + $0x1b0] sm:$0xff]  ;;  %v68_v50 = vld [vmem:[#allocation5 + $0x88] sm:$0xff]  ;;  %v51_v53 = vld [vmem:[#allocation5] sm:$0xff] }
  0x1d   :  { %179 = vmatpush.msra.mxu1 %v74_v26  ;;  %217 = vmatpush.msra.mxu3 %v108_v36  ;;  %v104_v52 = vld [vmem:[#allocation5 + $0x1a8] sm:$0xff]  ;;  %v67_v54 = vld [vmem:[#allocation5 + $0x80] sm:$0xff]  ;;  %v130_v55 = vld [vmem:[#allocation5 + $0x278] sm:$0xff] }
  0x1e   :  { %160 = vmatpush.msra.mxu0 %v57_v29  ;;  %198 = vmatpush.msra.mxu2 %v91_v35  ;;  %v146_v56 = vld [vmem:[#allocation5 + $0x2f8] sm:$0xff]  ;;  %v103_v58 = vld [vmem:[#allocation5 + $0x1a0] sm:$0xff]  ;;  %v129_v59 = vld [vmem:[#allocation5 + $0x270] sm:$0xff] }
  0x1f   :  { %180 = vmatpush.msra.mxu1 %v73_v30  ;;  %218 = vmatpush.msra.mxu3 %v107_v40  ;;  %v86_v57 = vld [vmem:[#allocation5 + $0x118] sm:$0xff]  ;;  %v145_v60 = vld [vmem:[#allocation5 + $0x2f0] sm:$0xff]  ;;  %v128_v63 = vld [vmem:[#allocation5 + $0x268] sm:$0xff] }
  0x20   :  { %161 = vmatpush.msra.mxu0 %v56_v33  ;;  %199 = vmatpush.msra.mxu2 %v90_v39  ;;  %v85_v61 = vld [vmem:[#allocation5 + $0x110] sm:$0xff]  ;;  %v102_v62 = vld [vmem:[#allocation5 + $0x198] sm:$0xff]  ;;  %v144_v0 = vld [vmem:[#allocation5 + $0x2e8] sm:$0xff] }
  0x21   :  { %181 = vmatpush.msra.mxu1 %v72_v34  ;;  %219 = vmatpush.msra.mxu3 %v106_v44  ;;  %v84_v1 = vld [vmem:[#allocation5 + $0x108] sm:$0xff]  ;;  %v101_v2 = vld [vmem:[#allocation5 + $0x190] sm:$0xff]  ;;  %v127_v3 = vld [vmem:[#allocation5 + $0x260] sm:$0xff] }
  0x22   :  { %162 = vmatpush.msra.mxu0 %v55_v37  ;;  %200 = vmatpush.msra.mxu2 %v89_v43  ;;  %v143_v4 = vld [vmem:[#allocation5 + $0x2e0] sm:$0xff]  ;;  %v100_v6 = vld [vmem:[#allocation5 + $0x188] sm:$0xff]  ;;  %v126_v7 = vld [vmem:[#allocation5 + $0x258] sm:$0xff] }
  0x23   :  { %182 = vmatpush.msra.mxu1 %v71_v38  ;;  %220 = vmatpush.msra.mxu3 %v105_v48  ;;  %v83_v5 = vld [vmem:[#allocation5 + $0x100] sm:$0xff]  ;;  %v142_v8 = vld [vmem:[#allocation5 + $0x2d8] sm:$0xff]  ;;  %v125_v11 = vld [vmem:[#allocation5 + $0x250] sm:$0xff] }
  0x24   :  { %163 = vmatpush.msra.mxu0 %v54_v41  ;;  %201 = vmatpush.msra.mxu2 %v88_v47  ;;  %v47_v9 = vld [vmem:[#allocation2 + $0x10] sm:$0xff]  ;;  %v141_v12 = vld [vmem:[#allocation5 + $0x2d0] sm:$0xff]  ;;  %v48_v14 = vld [vmem:[#allocation2 + $0x18] sm:$0xff] }
  0x25   :  { %183 = vmatpush.msra.mxu1 %v70_v42  ;;  %221 = vmatpush.msra.mxu3 %v104_v52  ;;  %v99_v10 = vld [vmem:[#allocation5 + $0x180] sm:$0xff]  ;;  %v45_v13 = vld [vmem:[#allocation2] sm:$0xff]  ;;  %v124_v15 = vld [vmem:[#allocation5 + $0x248] sm:$0xff] }
  0x26   :  { %164 = vmatpush.msra.mxu0 %v53_v45  ;;  %202 = vmatpush.msra.mxu2 %v87_v51  ;;  %v140_v16 = vld [vmem:[#allocation5 + $0x2c8] sm:$0xff]  ;;  %v46_v17 = vld [vmem:[#allocation2 + $0x8] sm:$0xff]  ;;  %v123_v18 = vld [vmem:[#allocation5 + $0x240] sm:$0xff] }
  0x27   :  { %184 = vmatpush.msra.mxu1 %v69_v46  ;;  %222 = vmatpush.msra.mxu3 %v103_v58  ;;  %v139_v19 = vld [vmem:[#allocation5 + $0x2c0] sm:$0xff]  ;;  %v122_v20 = vld [vmem:[#allocation5 + $0x238] sm:$0xff]  ;;  %v121_v22 = vld [vmem:[#allocation5 + $0x230] sm:$0xff] }
  0x28   :  { %165 = vmatpush.msra.mxu0 %v52_v49  ;;  %203 = vmatpush.msra.mxu2 %v86_v57  ;;  %v138_v21 = vld [vmem:[#allocation5 + $0x2b8] sm:$0xff]  ;;  %v137_v23 = vld [vmem:[#allocation5 + $0x2b0] sm:$0xff]  ;;  %v120_v24 = vld [vmem:[#allocation5 + $0x228] sm:$0xff] }
  0x29   :  { %185 = vmatpush.msra.mxu1 %v68_v50  ;;  %223 = vmatpush.msra.mxu3 %v102_v62  ;;  %v136_v25 = vld [vmem:[#allocation5 + $0x2a8] sm:$0xff]  ;;  %v119_v26 = vld [vmem:[#allocation5 + $0x220] sm:$0xff]  ;;  %v118_v28 = vld [vmem:[#allocation5 + $0x218] sm:$0xff] }
  0x2a   :  { %166 = vmatpush.msra.mxu0 %v51_v53  ;;  %204 = vmatpush.msra.mxu2 %v85_v61  ;;  %v135_v27 = vld [vmem:[#allocation5 + $0x2a0] sm:$0xff]  ;;  %v134_v29 = vld [vmem:[#allocation5 + $0x298] sm:$0xff]  ;;  %v117_v30 = vld [vmem:[#allocation5 + $0x210] sm:$0xff] }
  0x2b   :  { %186 = vmatpush.msra.mxu1 %v67_v54  ;;  %224 = vmatpush.msra.mxu3 %v101_v2  ;;  %v133_v31 = vld [vmem:[#allocation5 + $0x290] sm:$0xff]  ;;  %v116_v32 = vld [vmem:[#allocation5 + $0x208] sm:$0xff]  ;;  %v115_v34 = vld [vmem:[#allocation5 + $0x200] sm:$0xff] }
  0x2c   :  { %231 = vmatpush.msrb.mxu0 %v130_v55  ;;  %205 = vmatpush.msra.mxu2 %v84_v1  ;;  %v132_v33 = vld [vmem:[#allocation5 + $0x288] sm:$0xff]  ;;  %v131_v35 = vld [vmem:[#allocation5 + $0x280] sm:$0xff]  ;;  %v49_v36 = vld [vmem:[#allocation2 + $0x20] sm:$0xff] }
  0x2d   :  { %251 = vmatpush.msrb.mxu1 %v146_v56  ;;  %225 = vmatpush.msra.mxu3 %v100_v6  ;;  %v50_v37 = vld [vmem:[#allocation2 + $0x28] sm:$0xff]  ;;  %v295_v38 = vld [vmem:[%s413_s2] ss:$0 sm:$0xff] }
  0x2e   :  { %232 = vmatpush.msrb.mxu0 %v129_v59  ;;  %206 = vmatpush.msra.mxu2 %v83_v5 }
  0x2f   :  { %252 = vmatpush.msrb.mxu1 %v145_v60  ;;  %207 = vmatmul.f32.vlgmr.msra.gmra.mxu2 %v47_v9 }
  0x30   :  { %233 = vmatpush.msrb.mxu0 %v128_v63  ;;  %226 = vmatpush.msra.mxu3 %v99_v10 }
  0x31   :  { %253 = vmatpush.msrb.mxu1 %v144_v0  ;;  %167 = vmatmul.f32.vlgmr.msra.gmra.mxu0 %v45_v13 }
  0x32   :  { %234 = vmatpush.msrb.mxu0 %v127_v3  ;;  %227 = vmatmul.f32.vlgmr.msra.gmra.mxu3 %v48_v14 }
  0x33   :  { %254 = vmatpush.msrb.mxu1 %v143_v4 }
  0x34   :  { %235 = vmatpush.msrb.mxu0 %v126_v7  ;;  %187 = vmatmul.f32.vlgmr.msra.gmra.mxu1 %v46_v17 }
  0x35   :  { %255 = vmatpush.msrb.mxu1 %v142_v8 }
  0x36   :  { %236 = vmatpush.msrb.mxu0 %v125_v11 }
  0x37   :  { %256 = vmatpush.msrb.mxu1 %v141_v12 }
  0x38   :  { %237 = vmatpush.msrb.mxu0 %v124_v15 }
  0x39   :  { %257 = vmatpush.msrb.mxu1 %v140_v16 }
  0x3a   :  { %238 = vmatpush.msrb.mxu0 %v123_v18 }
  0x3b   :  { %258 = vmatpush.msrb.mxu1 %v139_v19 }
  0x3c   :  { %239 = vmatpush.msrb.mxu0 %v122_v20 }
  0x3d   :  { %259 = vmatpush.msrb.mxu1 %v138_v21 }
  0x3e   :  { %240 = vmatpush.msrb.mxu0 %v121_v22 }
  0x3f   :  { %260 = vmatpush.msrb.mxu1 %v137_v23 }
  0x40   :  { %241 = vmatpush.msrb.mxu0 %v120_v24 }
  0x41   :  { %261 = vmatpush.msrb.mxu1 %v136_v25 }
  0x42   :  { %242 = vmatpush.msrb.mxu0 %v119_v26 }
  0x43   :  { %262 = vmatpush.msrb.mxu1 %v135_v27 }
  0x44   :  { %243 = vmatpush.msrb.mxu0 %v118_v28 }
  0x45   :  { %263 = vmatpush.msrb.mxu1 %v134_v29 }
  0x46   :  { %244 = vmatpush.msrb.mxu0 %v117_v30 }
  0x47   :  { %264 = vmatpush.msrb.mxu1 %v133_v31 }
  0x48   :  { %245 = vmatpush.msrb.mxu0 %v116_v32 }
  0x49   :  { %265 = vmatpush.msrb.mxu1 %v132_v33 }
  0x4a   :  { %246 = vmatpush.msrb.mxu0 %v115_v34 }
  0x4b   :  { %266 = vmatpush.msrb.mxu1 %v131_v35  ;;  %247 = vmatmul.f32.vlgmr.msrb.gmra.mxu0 %v49_v36 }
  0x4c   :  { %267 = vmatmul.f32.vlgmr.msrb.gmra.mxu1 %v50_v37 }
  0xae   :  { %v168_v39 = vpop.f32.mrf.mxu0 }
  0xaf   :  { %v169_v40 = vadd.f32 %v295_v38, %v168_v39 }
  0xb1   :  { %v188_v41 = vpop.f32.mrf.mxu1 }
  0xb2   :  { %v189_v42 = vadd.f32 %v188_v41, %v169_v40  ;;  %v208_v43 = vpop.f32.mrf.mxu2 }
  0xb4   :  { %v209_v44 = vadd.f32 %v208_v43, %v189_v42 }
  0xb5   :  { %v228_v45 = vpop.f32.mrf.mxu3 }
  0xb6   :  { %v229_v46 = vadd.f32 %v228_v45, %v209_v44 }
  0xc8   :  { %v248_v47 = vpop.f32.mrf.mxu0 }
  0xc9   :  { %v268_v48 = vpop.f32.mrf.mxu1  ;;  %v249_v49 = vadd.f32 %v248_v47, %v229_v46 }
  0xcb   :  { %v269_v50 = vadd.f32 %v268_v48, %v249_v49 }
  0xcd   :  { %271 = vst [vmem:[#allocation7] sm:$0xff] %v269_v50 }
  0xce   :  { %282 = dma.vmem_to_hbm [thread:$0]  %s278_s25, 128, %s280_s28, [#allocation4]  }
  0xcf   :  { %372 = dma.done.wait [#allocation4], 128  }
  0xd0   :  { %373 = vsyncadd [#allocation4], 4294967168 }
  0xd1   :  { %287 = vsyncpa [#allocation3], 1 }
  0xd2   :  { %288 = vsyncpa [#allocation6], 1 }
  0xd3   :  { %289 = vsyncpa [#allocation4], 1 }

</bundles_post_ra>
